<compile_context>
chip_gen: v7x
topology: tpu7x:2x2x1
jax: 0.10.0
libtpu: 0.0.40
codegen_flags: <defaults>
</compile_context>

<pallas_src>
import functools

import jax
import jax.numpy as jnp
from jax.experimental import pallas as pl
from jax.experimental.pallas import tpu as pltpu


def _round_up(x: int, m: int) -> int:
    return (x + m - 1) // m * m


# ---------------------------------------------------------------------------
# Stages 1 & 3: fused matmul + bias, grid-parallel over output tiles.
# Activations stay in their HBM dtype and are cast to the MXU operand dtype
# in-kernel (no extra XLA cast pass); weights are cast once in the wrapper
# (halves their HBM traffic when bf16).
# ---------------------------------------------------------------------------
def _matmul_bias_kernel(x_ref, w_ref, b_ref, o_ref, *, operand_dtype):
    acc = jnp.dot(x_ref[...].astype(operand_dtype), w_ref[...],
                  preferred_element_type=jnp.float32)
    o_ref[...] = (acc + b_ref[...]).astype(o_ref.dtype)


def _pallas_matmul_bias(x, w, b, *, operand_dtype=jnp.bfloat16,
                        out_dtype=jnp.float32, tm_max=256, tn_max=512):
    """out = x @ w + b.   x:(M,K)  w:(K,N)  b:(1,N)  ->  (M,N) out_dtype."""
    M, K = x.shape
    N = w.shape[1]

    # Row tile aligned for sublane packing of the output dtype.
    row_align = 16 if jnp.dtype(out_dtype).itemsize < 4 else 8
    tm = min(tm_max, _round_up(M, row_align))
    Mp = _round_up(M, tm)
    tn = N if N <= tn_max else tn_max
    Np = _round_up(N, tn)

    w = w.astype(operand_dtype)
    b = b.astype(jnp.float32)
    if Mp != M:
        x = jnp.pad(x, ((0, Mp - M), (0, 0)))
    if Np != N:
        w = jnp.pad(w, ((0, 0), (0, Np - N)))
        b = jnp.pad(b, ((0, 0), (0, Np - N)))

    # Explicit VMEM budget so the larger tiles still compile on v5e's 16 MiB
    # default scoped VMEM (double-buffered blocks).
    needed = 2 * (tm * K * x.dtype.itemsize
                  + K * tn * jnp.dtype(operand_dtype).itemsize
                  + tn * 4
                  + tm * tn * jnp.dtype(out_dtype).itemsize)
    vmem_limit = int(min(64 * 2**20, max(32 * 2**20, 2 * needed)))

    out = pl.pallas_call(
        functools.partial(_matmul_bias_kernel, operand_dtype=operand_dtype),
        out_shape=jax.ShapeDtypeStruct((Mp, Np), out_dtype),
        grid=(Mp // tm, Np // tn),
        in_specs=[
            pl.BlockSpec((tm, K), lambda i, j: (i, 0)),
            pl.BlockSpec((K, tn), lambda i, j: (0, j)),
            pl.BlockSpec((1, tn), lambda i, j: (0, j)),
        ],
        out_specs=pl.BlockSpec((tm, tn), lambda i, j: (i, j)),
        compiler_params=pltpu.CompilerParams(
            dimension_semantics=("parallel", "parallel"),
            vmem_limit_bytes=vmem_limit),
    )(x, w, b)
    # TODO(synk): add a K grid axis + f32 VMEM accumulator (P3 pattern) if E/Hp
    # grow beyond a few thousand, instead of keeping K un-tiled.

    if Mp != M or Np != N:
        out = out[:M, :N]
    return out


# ---------------------------------------------------------------------------
# Stage 2: serial LSTM recurrence (see header comment for the layout story).
# ---------------------------------------------------------------------------
def _lstm_recurrence_kernel(gx_ref, whh_ref, hseq_ref, h_ref, c_ref):
    TC = gx_ref.shape[0]
    Hp = whh_ref.shape[0]

    @pl.when(pl.program_id(1) == 0)           # first time-chunk of this batch tile
    def _():
        h_ref[...] = jnp.zeros_like(h_ref)
        c_ref[...] = jnp.zeros_like(c_ref)

    whh = whh_ref[...]                        # resident across the whole chunk
    h = h_ref[...]
    c = c_ref[...]
    # Short static unroll (TC <= 8) keeps vreg pressure bounded.
    for j in range(TC):
        # Only the recurrent matmul is on the serial critical path.
        gates = gx_ref[j].astype(jnp.float32) + jnp.dot(
            h.astype(whh.dtype), whh, preferred_element_type=jnp.float32)
        # Gate blocks are 128-lane aligned -> pure lane-aligned static slicing.
        i_g = jax.nn.sigmoid(gates[:, 0 * Hp:1 * Hp])
        f_g = jax.nn.sigmoid(gates[:, 1 * Hp:2 * Hp])
        g_g = jnp.tanh(gates[:, 2 * Hp:3 * Hp])
        o_g = jax.nn.sigmoid(gates[:, 3 * Hp:4 * Hp])
        c = f_g * c + i_g * g_g
        h = o_g * jnp.tanh(c)
        # Batch-first, lane-dense, unmasked store of this timestep's hidden.
        hseq_ref[:, j * Hp:(j + 1) * Hp] = h.astype(hseq_ref.dtype)
    h_ref[...] = h
    c_ref[...] = c


def _pallas_lstm_recurrence(gates_tm, whh_p, *, tb, tc):
    """gates_tm: (Tp, Bp, 4Hp), whh_p: (Hp, 4Hp) -> hseq (Bp, Tp*Hp) f32."""
    Tp, Bp, G = gates_tm.shape
    Hp = whh_p.shape[0]
    return pl.pallas_call(
        _lstm_recurrence_kernel,
        out_shape=jax.ShapeDtypeStruct((Bp, Tp * Hp), jnp.float32),
        grid=(Bp // tb, Tp // tc),
        in_specs=[
            pl.BlockSpec((tc, tb, G), lambda b, t: (t, b, 0)),   # streamed gx chunk
            pl.BlockSpec((Hp, G), lambda b, t: (0, 0)),          # resident W_hh
        ],
        out_specs=pl.BlockSpec((tb, tc * Hp), lambda b, t: (b, t)),
        scratch_shapes=[pltpu.VMEM((tb, Hp), jnp.float32),       # h carry
                        pltpu.VMEM((tb, Hp), jnp.float32)],      # c carry
        compiler_params=pltpu.CompilerParams(
            dimension_semantics=("parallel", "arbitrary")),
    )(gates_tm, whh_p)


# ---------------------------------------------------------------------------
# Full forward pass.
# ---------------------------------------------------------------------------
def decoder_rnn_forward(features, captions, params, *, matmul_dtype=jnp.bfloat16):
    """features: (B, E); captions: (B, L) int32.  Returns (B, L, V) float32."""
    emb_table = params["embed"].astype(jnp.float32)   # (V, E)
    w_ih = params["w_ih"].astype(jnp.float32)         # (4H, E) PyTorch layout
    w_hh = params["w_hh"].astype(jnp.float32)         # (4H, H)
    b_ih = params["b_ih"].astype(jnp.float32)         # (4H,)
    b_hh = params["b_hh"].astype(jnp.float32)         # (4H,)
    w_lin = params["w_lin"].astype(jnp.float32)       # (V, H)
    b_lin = params["b_lin"].astype(jnp.float32)       # (V,)

    B, E = features.shape
    L = captions.shape[1]
    H = w_hh.shape[1]
    V = emb_table.shape[0]
    Hp = _round_up(H, 128)          # lane-pad each gate / hidden block
    Vp = _round_up(V, 128)          # lane-pad vocab for unmasked stores

    T = L                           # LSTM sequence length (features + L-1 tokens)
    TC = min(8, T)                  # time-chunk / unroll per Stage-2 grid step
    Tp = _round_up(T, TC)
    tb = 8 if B <= 8 else 16        # batch tile (sublane / bf16-packing aligned)
    Bp = _round_up(B, tb)

    # --- glue: batch pad, embedding gather, time-major sequence --------------
    feats_p = jnp.zeros((Bp, E), jnp.float32).at[:B].set(features.astype(jnp.float32))
    caps_p = jnp.zeros((Bp, L), captions.dtype).at[:B].set(captions)
    emb_tm = jnp.take(emb_table, caps_p[:, :-1].T, axis=0)            # (T-1, Bp, E)
    seq_tm = jnp.concatenate([feats_p[None], emb_tm], axis=0)         # (T, Bp, E)
    if Tp != T:
        seq_tm = jnp.pad(seq_tm, ((0, Tp - T), (0, 0), (0, 0)))

    # --- parameter re-layout (once, outside the hot loop) --------------------
    # PyTorch gate order along 4H is [i, f, g, o]; each block zero-padded H->Hp,
    # so padded h/c columns stay exactly 0 through the recurrence.
    w_ih_g = w_ih.reshape(4, H, E)
    w_ih_p = jnp.zeros((4, Hp, E), jnp.float32).at[:, :H, :].set(w_ih_g)
    w_ih_p = jnp.transpose(w_ih_p, (2, 0, 1)).reshape(E, 4 * Hp)      # (E, 4Hp)

    w_hh_g = w_hh.reshape(4, H, H)
    w_hh_p = jnp.zeros((4, Hp, Hp), jnp.float32).at[:, :H, :H].set(w_hh_g)
    w_hh_p = jnp.transpose(w_hh_p, (2, 0, 1)).reshape(Hp, 4 * Hp)     # (Hp, 4Hp)

    b_g = (b_ih + b_hh).reshape(4, H)
    b_p = jnp.zeros((4, Hp), jnp.float32).at[:, :H].set(b_g).reshape(1, 4 * Hp)

    w_out_p = jnp.zeros((Hp, Vp), jnp.float32).at[:H, :V].set(w_lin.T)  # (Hp, Vp)
    b_out_p = jnp.zeros((1, Vp), jnp.float32).at[:, :V].set(b_lin[None, :])

    # --- Stage 1: input projection for ALL timesteps (hoisted off the loop) --
    gate_dtype = matmul_dtype if jnp.dtype(matmul_dtype).itemsize < 4 else jnp.float32
    gates_flat = _pallas_matmul_bias(
        seq_tm.reshape(Tp * Bp, E), w_ih_p, b_p,
        operand_dtype=matmul_dtype, out_dtype=gate_dtype, tm_max=256)   # (Tp*Bp, 4Hp)
    gates_tm = gates_flat.reshape(Tp, Bp, 4 * Hp)

    # --- Stage 2: serial recurrence (only h @ W_hh per step) -----------------
    hseq = _pallas_lstm_recurrence(gates_tm, w_hh_p.astype(matmul_dtype),
                                   tb=tb, tc=TC)                        # (Bp, Tp*Hp)

    # --- Stage 3: vocab projection; batch-first rows via a FREE reshape ------
    h_flat = hseq.reshape(Bp * Tp, Hp)       # row-major view: row = b*Tp + t
    logits = _pallas_matmul_bias(
        h_flat, w_out_p, b_out_p,
        operand_dtype=matmul_dtype, out_dtype=jnp.float32, tm_max=512)  # (Bp*Tp, Vp)
    return logits.reshape(Bp, Tp, Vp)[:B, :T, :V]


# ---------------------------------------------------------------------------
# Pure-JAX reference replicating the PyTorch forward.
# ---------------------------------------------------------------------------
def _reference_forward(features, captions, params):
    emb_table = params["embed"]
    w_ih, w_hh = params["w_ih"], params["w_hh"]
    b_ih, b_hh = params["b_ih"], params["b_hh"]
    w_lin, b_lin = params["w_lin"], params["b_lin"]
    H = w_hh.shape[1]

    embeddings = jnp.take(emb_table, captions[:, :-1], axis=0)
    seq = jnp.concatenate([features[:, None, :], embeddings], axis=1)   # (B, T, E)
    B, T, _ = seq.shape

    def step(carry, x_t):
        h, c = carry
        gates = x_t @ w_ih.T + h @ w_hh.T + b_ih + b_hh
        i = jax.nn.sigmoid(gates[:, 0 * H:1 * H])
        f = jax.nn.sigmoid(gates[:, 1 * H:2 * H])
        g = jnp.tanh(gates[:, 2 * H:3 * H])
        o = jax.nn.sigmoid(gates[:, 3 * H:4 * H])
        c_new = f * c + i * g
        h_new = o * jnp.tanh(c_new)
        return (h_new, c_new), h_new

    h0 = jnp.zeros((B, H), jnp.float32)
    c0 = jnp.zeros((B, H), jnp.float32)
    _, hs = jax.lax.scan(step, (h0, c0), jnp.transpose(seq, (1, 0, 2)))
    hs = jnp.transpose(hs, (1, 0, 2))                                   # (B, T, H)
    return hs @ w_lin.T + b_lin


if __name__ == "__main__":
    # DecoderRNN(embed_size=32, hidden_size=32, vocab_size=64), batch=2, len=8.
    B, L = 2, 8
    E, H, V = 32, 32, 64

    key = jax.random.PRNGKey(0)
    ks = jax.random.split(key, 9)
    scale = 1.0 / jnp.sqrt(H)
    params = {
        "embed": jax.random.normal(ks[0], (V, E), jnp.float32) * 0.1,
        "w_ih": jax.random.uniform(ks[1], (4 * H, E), jnp.float32, -scale, scale),
        "w_hh": jax.random.uniform(ks[2], (4 * H, H), jnp.float32, -scale, scale),
        "b_ih": jax.random.uniform(ks[3], (4 * H,), jnp.float32, -scale, scale),
        "b_hh": jax.random.uniform(ks[4], (4 * H,), jnp.float32, -scale, scale),
        "w_lin": jax.random.uniform(ks[5], (V, H), jnp.float32, -scale, scale),
        "b_lin": jax.random.uniform(ks[6], (V,), jnp.float32, -scale, scale),
    }

    features = jax.random.normal(ks[7], (B, E), jnp.float32)
    captions = jax.random.randint(ks[8], (B, L), 0, V, jnp.int32)

    # Perf path: bf16 MXU operands + bf16 gate-slab intermediate (default).
    out_bf16 = jax.block_until_ready(decoder_rnn_forward(features, captions, params))
    # Same kernels with f32 operands for a tight structural-correctness check.
    out_f32 = jax.block_until_ready(
        decoder_rnn_forward(features, captions, params, matmul_dtype=jnp.float32))

    ref = _reference_forward(features, captions, params)
    assert out_bf16.shape == (B, L, V), out_bf16.shape
    assert out_f32.shape == (B, L, V), out_f32.shape
    assert jnp.allclose(out_f32, ref, atol=1e-4, rtol=1e-4), "f32 path mismatch"
    assert jnp.allclose(out_bf16, ref, atol=6e-2, rtol=6e-2), "bf16 path mismatch"

    print("KERNEL_OK")
</pallas_src>

<mosaic_0001>
module attributes {stable_mosaic.version = 11 : i64} {
  func.func @_matmul_bias_kernel(%arg0: i32, %arg1: i32, %arg2: memref<64x32xf32, #tpu.memory_space<vmem>>, %arg3: memref<32x512xbf16, #tpu.memory_space<vmem>>, %arg4: memref<1x512xf32, #tpu.memory_space<vmem>>, %arg5: memref<64x512xbf16, #tpu.memory_space<vmem>>) attributes {dimension_semantics = [#tpu.dimension_semantics<parallel>, #tpu.dimension_semantics<parallel>], iteration_bounds = array<i64: 1, 1>, scalar_prefetch = 0 : i64, scratch_operands = 0 : i64, tpu.core_type = #tpu.core_type<tc>, window_params = [{transform_indices = @transform_0, window_bounds = array<i64: 64, 32>}, {transform_indices = @transform_1, window_bounds = array<i64: 32, 512>}, {transform_indices = @transform_2, window_bounds = array<i64: 1, 512>}, {transform_indices = @transform_3, window_bounds = array<i64: 64, 512>}]} {
    %c0 = arith.constant 0 : index
    %c0_0 = arith.constant 0 : index
    %0 = vector.load %arg2[%c0, %c0_0] : memref<64x32xf32, #tpu.memory_space<vmem>>, vector<64x32xf32>
    %1 = arith.truncf %0 : vector<64x32xf32> to vector<64x32xbf16>
    %c0_1 = arith.constant 0 : index
    %c0_2 = arith.constant 0 : index
    %2 = vector.load %arg3[%c0_1, %c0_2] : memref<32x512xbf16, #tpu.memory_space<vmem>>, vector<32x512xbf16>
    %cst = arith.constant dense<0.000000e+00> : vector<64x512xf32>
    %3 = tpu.matmul %1, %2, %cst {dimension_numbers = #tpu.dot_dimension_numbers<[1], [0], [0], [1], [0, 0, 1, 1], [], []>} : vector<64x32xbf16>, vector<32x512xbf16>, vector<64x512xf32> -> vector<64x512xf32>
    %c0_3 = arith.constant 0 : index
    %c0_4 = arith.constant 0 : index
    %4 = vector.load %arg4[%c0_3, %c0_4] : memref<1x512xf32, #tpu.memory_space<vmem>>, vector<1x512xf32>
    %5 = vector.broadcast %4 : vector<1x512xf32> to vector<64x512xf32>
    %6 = arith.addf %3, %5 : vector<64x512xf32>
    %7 = arith.truncf %6 : vector<64x512xf32> to vector<64x512xbf16>
    %c0_5 = arith.constant 0 : index
    %c0_6 = arith.constant 0 : index
    %8 = vector.load %arg5[%c0_5, %c0_6] : memref<64x512xbf16, #tpu.memory_space<vmem>>, vector<64x512xbf16>
    tpu.vector_store %arg5[%c0_5, %c0_6], %7 {strides = array<i32>} : memref<64x512xbf16, #tpu.memory_space<vmem>>, vector<64x512xbf16>,
    return
  }
  func.func @transform_0(%arg0: i32, %arg1: i32) -> (i32, i32) {
    %c0_i32 = arith.constant 0 : i32
    %c0_i32_0 = arith.constant 0 : i32
    return %arg0, %c0_i32 : i32, i32
  }
  func.func @transform_1(%arg0: i32, %arg1: i32) -> (i32, i32) {
    %c0_i32 = arith.constant 0 : i32
    %c0_i32_0 = arith.constant 0 : i32
    return %c0_i32, %arg1 : i32, i32
  }
  func.func @transform_2(%arg0: i32, %arg1: i32) -> (i32, i32) {
    %c0_i32 = arith.constant 0 : i32
    %c0_i32_0 = arith.constant 0 : i32
    return %c0_i32, %arg1 : i32, i32
  }
  func.func @transform_3(%arg0: i32, %arg1: i32) -> (i32, i32) {
    %c0_i32 = arith.constant 0 : i32
    return %arg0, %arg1 : i32, i32
  }
}

</mosaic_0001>

<bundles_post_ra>
// kernel: tpu_custom_call.1
= control target key start
LH: loop header
LB: loop body
LE: loop exit
PB: predicated region body
PF: predicated region fallthrough
CT: control target
= control target key end

     0   :  { %v473_v2 = vmov 0   ;;  %vm98_vm0 = vcmask 261120   ;;  %s608_s0 = inlined_call_operand.vmem [shape: f32[64,32], index: 0, kind: input, shape index: {}]   ;;  %s609_s1 = inlined_call_operand.vmem [shape: bf16[32,512], index: 1, kind: input, shape index: {}]   ;;  %s610_s2 = inlined_call_operand.vmem [shape: f32[1,512], index: 2, kind: input, shape index: {}]   ;;  %s611_s3 = inlined_call_operand.hbm [shape: bf16[64,512], index: 3, kind: output, shape index: {}]  }
   0x1   :  { %v437_v0 = vld [vmem:[%s609_s1 + $0x4] ss:$16 sps:$4 sm:$0xff]   ;;  %v439_v1 = vld [vmem:[%s609_s1 + $0xc] ss:$16 sps:$4 sm:$0xff]   ;;  %143 = vmatprep.mubr.bf16.mxu0 %v473_v2  ;;  %216 = vmatprep.mubr.bf16.mxu1 %v473_v2  ;;  %v441_v3 = vld [vmem:[%s609_s1] ss:$16 sps:$4 sm:$0xff]  }
   0x2   :  { %111 = vmatprep.subr.bf16.mxu0 %v437_v0  ;;  %v442_v4 = vld [vmem:[%s609_s1 + $0x8] ss:$16 sps:$4 sm:$0xff]   ;;  %184 = vmatprep.subr.bf16.mxu1 %v439_v1  ;;  %v443_v5 = vld [vmem:[%s609_s1 + $0x24] ss:$16 sps:$4 sm:$0xff]   ;;  %v445_v6 = vld [vmem:[%s609_s1 + $0x2c] ss:$16 sps:$4 sm:$0xff]  }
   0x3   :  { %112 = vmatpush1.bf16.msra.mxu0 %v441_v3  ;;  %185 = vmatpush1.bf16.msra.mxu1 %v442_v4  ;;  %v447_v7 = vld [vmem:[%s609_s1 + $0x20] ss:$16 sps:$4 sm:$0xff]   ;;  %v448_v8 = vld [vmem:[%s609_s1 + $0x28] ss:$16 sps:$4 sm:$0xff]  }
   0x4   :  { %113 = vmatprep.subr.bf16.mxu0 %v443_v5  ;;  %v16_v9 = vld [vmem:[%s608_s0] sm:$0xff]  ;;  %v17_v10 = vld [vmem:[%s608_s0 + $0x8] sm:$0xff]  ;;  %186 = vmatprep.subr.bf16.mxu1 %v445_v6 }
   0x5   :  { %v24_v11 = vpack.c.bf16 %v17_v10, %v16_v9 }
   0x7   :  { %114 = vmatpush1.bf16.msra.mxu0 %v447_v7  ;;  %187 = vmatpush1.bf16.msra.mxu1 %v448_v8 }
   0x8   :  { %8 = vsyncpa [#allocation3], 0  ;;  %v18_v12 = vld [vmem:[%s608_s0 + $0x10] sm:$0xff]  ;;  %v19_v13 = vld [vmem:[%s608_s0 + $0x18] sm:$0xff]  ;;  %v38_v21 = vlaneseq }
   0x9   :  { %v25_v14 = vpack.c.bf16 %v19_v13, %v18_v12  ;;  %v20_v15 = vld [vmem:[%s608_s0 + $0x20] sm:$0xff]  ;;  %v21_v16 = vld [vmem:[%s608_s0 + $0x28] sm:$0xff]  ;;  %v22_v18 = vld [vmem:[%s608_s0 + $0x30] sm:$0xff] }
   0xa   :  { %393 = vmatmul.mubr.msk.bf16.vlgmr.msra.gmra.mrb[0].mxu0 %vm98_vm0, %v24_v11  ;;  %397 = vmatmul.mubr.msk.bf16.vlgmr.msra.gmra.mrb[0].mxu1 %vm98_vm0, %v24_v11  ;;  %v26_v17 = vpack.c.bf16 %v21_v16, %v20_v15  ;;  %v23_v19 = vld [vmem:[%s608_s0 + $0x38] sm:$0xff]  ;;  %v39_v22 = vshrl.u32 %v38_v21, 7  ;;  %v36_v25 = vld [vmem:[%s610_s2] sm:$0xf]  ;;  %s474_s0 = smov [#allocation2]  }
   0xb   :  { %153 = vmatprep.mubr.bf16.mxu0 %v473_v2  ;;  %226 = vmatprep.mubr.bf16.mxu1 %v473_v2  ;;  %v27_v20 = vpack.c.bf16 %v23_v19, %v22_v18  ;;  %s374_s2 = sshll.u32 %s474_s0, 4  ;;  %s375_s2 = int_to_ptr.vmem [resolvable:$true] %s374_s2 }
   0xc   :  { %v40_v23 = vsub.s32 0, %v39_v22  ;;  %v48_v24 = vsub.s32 2, %v39_v22  ;;  %v44_v26 = vsub.s32 1, %v39_v22  ;;  %v52_v27 = vsub.s32 3, %v39_v22  ;;  %s449_s18 = scalar_lea.vmem %s375_s2, 2048  ;;  %p454_p1 = scmp.lt.s32.totalorder %s375_s2, %s375_s2 }
   0xd   :  { %p450_p0 = scmp.ne.s32.totalorder %s375_s2, %s449_s18  ;;  %p455_p2 = scmp.lt.s32.totalorder %s449_s18, %s449_s18 }
   0xe   :  { %v556_v28 = vrot.slane %v36_v25, %v40_v23  ;;  %v558_v29 = vrot.slane %v36_v25, %v48_v24  ;;  %v560_v30 = vrot.slane %v36_v25, %v44_v26  ;;  %v562_v31 = vrot.slane %v36_v25, %v52_v27 }
   0xf   :  { %p456_p3 = por %p455_p2, %p454_p1 }
  0x11   :  { %p457_p4 = pnand %p456_p3, %p450_p0 }
  0x12   :  { %394 = vmatmul.mubr.msk.bf16.gmra.mrb[4].mxu0 %vm98_vm0, %v25_v14  ;;  %398 = vmatmul.mubr.msk.bf16.gmra.mrb[4].mxu1 %vm98_vm0, %v25_v14 }
  0x13   :  { %163 = vmatprep.mubr.bf16.mxu0 %v473_v2  ;;  %236 = vmatprep.mubr.bf16.mxu1 %v473_v2 }
  0x1a   :  { %395 = vmatmul.mubr.msk.bf16.gmra.mrb[8].mxu0 %vm98_vm0, %v26_v17  ;;  %399 = vmatmul.mubr.msk.bf16.gmra.mrb[8].mxu1 %vm98_vm0, %v26_v17 }
  0x1b   :  { %173 = vmatprep.mubr.bf16.mxu0 %v473_v2  ;;  %246 = vmatprep.mubr.bf16.mxu1 %v473_v2 }
  0x22   :  { %396 = vmatmul.mubr.msk.bf16.gmra.mrb[12].mxu0 %vm98_vm0, %v27_v20  ;;  %400 = vmatmul.mubr.msk.bf16.gmra.mrb[12].mxu1 %vm98_vm0, %v27_v20 }
  0xdd   :  { %v145_v32 = vpop.f32.mrb[0].mxu0  ;;  %v218_v33 = vpop.f32.mrb[0].mxu1 }
  0xde   :  { %v146_v34 = vadd.f32 %v145_v32, %v556_v28  ;;  %v219_v35 = vadd.f32 %v218_v33, %v558_v29  ;;  %v147_v36 = vpop.f32.mrb[1].mxu0  ;;  %v220_v37 = vpop.f32.mrb[1].mxu1 }
  0xdf   :  { %v148_v38 = vadd.f32 %v147_v36, %v560_v30  ;;  %v221_v39 = vadd.f32 %v220_v37, %v562_v31  ;;  %v149_v40 = vpop.f32.mrb[2].mxu0  ;;  %v222_v41 = vpop.f32.mrb[2].mxu1 }
  0xe0   :  { %v150_v42 = vadd.f32 %v149_v40, %v556_v28  ;;  %v223_v43 = vadd.f32 %v222_v41, %v558_v29  ;;  %v151_v44 = vpop.f32.mrb[3].mxu0  ;;  %v224_v45 = vpop.f32.mrb[3].mxu1 }
  0xe1   :  { %v417_v46 = vpack.c.bf16 %v148_v38, %v146_v34  ;;  %v418_v47 = vpack.c.bf16 %v221_v39, %v219_v35  ;;  %v152_v48 = vadd.f32 %v151_v44, %v560_v30  ;;  %v225_v49 = vadd.f32 %v224_v45, %v562_v31 }
  0xe3   :  { %353 = vst [vmem:[#allocation2] sm:$0xff] %v417_v46  ;;  %354 = vst [vmem:[#allocation2 + $0x8] sm:$0xff] %v418_v47  ;;  %v419_v50 = vpack.c.bf16 %v152_v48, %v150_v42  ;;  %v420_v51 = vpack.c.bf16 %v225_v49, %v223_v43 }
  0xe5   :  { %355 = vst [vmem:[#allocation2 + $0x10] sm:$0xff] %v419_v50  ;;  %356 = vst [vmem:[#allocation2 + $0x18] sm:$0xff] %v420_v51  ;;  %v155_v52 = vpop.f32.mrb[4].mxu0  ;;  %v228_v53 = vpop.f32.mrb[4].mxu1 }
  0xe6   :  { %v156_v54 = vadd.f32 %v155_v52, %v556_v28  ;;  %v229_v55 = vadd.f32 %v228_v53, %v558_v29  ;;  %v157_v56 = vpop.f32.mrb[5].mxu0  ;;  %v230_v57 = vpop.f32.mrb[5].mxu1 }
  0xe7   :  { %v158_v58 = vadd.f32 %v157_v56, %v560_v30  ;;  %v231_v59 = vadd.f32 %v230_v57, %v562_v31  ;;  %v159_v60 = vpop.f32.mrb[6].mxu0  ;;  %v232_v61 = vpop.f32.mrb[6].mxu1 }
  0xe8   :  { %v160_v62 = vadd.f32 %v159_v60, %v556_v28  ;;  %v233_v63 = vadd.f32 %v232_v61, %v558_v29  ;;  %v161_v0 = vpop.f32.mrb[7].mxu0  ;;  %v234_v1 = vpop.f32.mrb[7].mxu1 }
  0xe9   :  { %v421_v2 = vpack.c.bf16 %v158_v58, %v156_v54  ;;  %v422_v3 = vpack.c.bf16 %v231_v59, %v229_v55  ;;  %v162_v4 = vadd.f32 %v161_v0, %v560_v30  ;;  %v235_v5 = vadd.f32 %v234_v1, %v562_v31 }
  0xeb   :  { %357 = vst [vmem:[#allocation2 + $0x20] sm:$0xff] %v421_v2  ;;  %358 = vst [vmem:[#allocation2 + $0x28] sm:$0xff] %v422_v3  ;;  %v423_v6 = vpack.c.bf16 %v162_v4, %v160_v62  ;;  %v424_v7 = vpack.c.bf16 %v235_v5, %v233_v63 }
  0xed   :  { %359 = vst [vmem:[#allocation2 + $0x30] sm:$0xff] %v423_v6  ;;  %360 = vst [vmem:[#allocation2 + $0x38] sm:$0xff] %v424_v7  ;;  %v165_v8 = vpop.f32.mrb[8].mxu0  ;;  %v238_v9 = vpop.f32.mrb[8].mxu1 }
  0xee   :  { %v166_v10 = vadd.f32 %v165_v8, %v556_v28  ;;  %v239_v11 = vadd.f32 %v238_v9, %v558_v29  ;;  %v167_v12 = vpop.f32.mrb[9].mxu0  ;;  %v240_v13 = vpop.f32.mrb[9].mxu1 }
  0xef   :  { %v168_v14 = vadd.f32 %v167_v12, %v560_v30  ;;  %v241_v15 = vadd.f32 %v240_v13, %v562_v31  ;;  %v169_v16 = vpop.f32.mrb[10].mxu0  ;;  %v242_v17 = vpop.f32.mrb[10].mxu1 }
  0xf0   :  { %v170_v18 = vadd.f32 %v169_v16, %v556_v28  ;;  %v243_v19 = vadd.f32 %v242_v17, %v558_v29  ;;  %v171_v20 = vpop.f32.mrb[11].mxu0  ;;  %v244_v21 = vpop.f32.mrb[11].mxu1 }
  0xf1   :  { %v425_v22 = vpack.c.bf16 %v168_v14, %v166_v10  ;;  %v426_v23 = vpack.c.bf16 %v241_v15, %v239_v11  ;;  %v172_v24 = vadd.f32 %v171_v20, %v560_v30  ;;  %v245_v25 = vadd.f32 %v244_v21, %v562_v31 }
  0xf3   :  { %361 = vst [vmem:[#allocation2 + $0x40] sm:$0xff] %v425_v22  ;;  %362 = vst [vmem:[#allocation2 + $0x48] sm:$0xff] %v426_v23  ;;  %v427_v26 = vpack.c.bf16 %v172_v24, %v170_v18  ;;  %v428_v27 = vpack.c.bf16 %v245_v25, %v243_v19 }
  0xf5   :  { %363 = vst [vmem:[#allocation2 + $0x50] sm:$0xff] %v427_v26  ;;  %364 = vst [vmem:[#allocation2 + $0x58] sm:$0xff] %v428_v27  ;;  %v175_v32 = vpop.f32.mrb[12].mxu0  ;;  %v248_v33 = vpop.f32.mrb[12].mxu1 }
  0xf6   :  { %v176_v34 = vadd.f32 %v175_v32, %v556_v28  ;;  %v249_v35 = vadd.f32 %v248_v33, %v558_v29  ;;  %v177_v36 = vpop.f32.mrb[13].mxu0  ;;  %v250_v37 = vpop.f32.mrb[13].mxu1 }
  0xf7   :  { %v178_v38 = vadd.f32 %v177_v36, %v560_v30  ;;  %v251_v39 = vadd.f32 %v250_v37, %v562_v31  ;;  %v179_v40 = vpop.f32.mrb[14].mxu0  ;;  %v252_v41 = vpop.f32.mrb[14].mxu1 }
  0xf8   :  { %v180_v42 = vadd.f32 %v179_v40, %v556_v28  ;;  %v253_v43 = vadd.f32 %v252_v41, %v558_v29  ;;  %v181_v44 = vpop.f32.mrb[15].mxu0  ;;  %v254_v45 = vpop.f32.mrb[15].mxu1 }
  0xf9   :  { %v429_v46 = vpack.c.bf16 %v178_v38, %v176_v34  ;;  %v430_v47 = vpack.c.bf16 %v251_v39, %v249_v35  ;;  %v182_v48 = vadd.f32 %v181_v44, %v560_v30  ;;  %v255_v49 = vadd.f32 %v254_v45, %v562_v31 }
  0xfb   :  { %365 = vst [vmem:[#allocation2 + $0x60] sm:$0xff] %v429_v46  ;;  %366 = vst [vmem:[#allocation2 + $0x68] sm:$0xff] %v430_v47  ;;  %v431_v50 = vpack.c.bf16 %v182_v48, %v180_v42  ;;  %v432_v51 = vpack.c.bf16 %v255_v49, %v253_v43 }
  0xfd   :  { %367 = vst [vmem:[#allocation2 + $0x70] sm:$0xff] %v431_v50  ;;  %368 = vst [vmem:[#allocation2 + $0x78] sm:$0xff] %v432_v51 }
  0xfe   :  { %460 = shalt.err (!%p457_p4)
}
  0xff   :  { %s461_s21 = scalar_lea.hbm %s611_s3, 2048 }
 0x100   :  { %p462_p5 = scmp.ne.s32.totalorder %s611_s3, %s461_s21  ;;  %p465_p6 = scmp.lt.u32.totalorder %s461_s21, %s611_s3 }
 0x102   :  { %p467_p7 = pnand %p465_p6, %p462_p5 }
 0x104   :  { %470 = shalt.err (!%p467_p7)
}
 0x105   :  { %s475_s26 = smov 256   ;;  %s476_s27 = smov 16  }
 0x106   :  { %380 = dma.vmem_to_hbm [thread:$0]  %s375_s2, 2048, %s611_s3, [#allocation3], %s475_s26, %s475_s26, %s476_s27  }
 0x107   :  { %471 = dma.done.wait [#allocation3], 2048  }
 0x108   :  { %472 = vsyncadd [#allocation3], 4294965248 }
 0x109   :  { %384 = vsyncpa [#allocation3], 1 }

</bundles_post_ra>
